<compile_context>
chip_gen: v5e
topology: v5e:2x2
jax: 0.10.0
libtpu: 0.0.40
codegen_flags: <defaults>
</compile_context>

<pallas_src>
from functools import partial

import jax
import jax.numpy as jnp
from jax.experimental import pallas as pl
from jax.experimental.pallas import tpu as pltpu

LN_EPS = 1e-5
LANE = 128        # lane width
ROW_GRAN = 16     # bf16 sublane packing granularity for the row tile
MAX_ROW_TILE = 512


def _round_up(x, m):
    return ((x + m - 1) // m) * m


def _pick_row_tile(n_rows):
    # Big tiles keep the MXU / store pipe busy (per-grid-step overhead ~0.35us),
    # but aim for >=2 grid steps on large inputs so v7x megacore can shard the
    # "parallel" row axis across both TensorCores.
    half = _round_up(max(1, (n_rows + 1) // 2), ROW_GRAN)
    return int(max(ROW_GRAN, min(MAX_ROW_TILE, half)))


# --------------------------------------------------------------------------- #
# Pallas kernel: one fused pass over a tile of (query+support) rows.
# --------------------------------------------------------------------------- #
def _extractor_kernel(
    ent_cat, nb_l, nb_r, inv_deg,
    ent_w, gcn_w, rs_wl, rs_we, rs_wr, p1_w, p2_w, consts,
    g_out,
    *, d_real, d_pad, h_pad, p1_pad,
):
    f32 = jnp.float32
    bf16 = jnp.bfloat16
    # bf16 MXU operands, f32 accumulation; elementwise stays f32 (v5e-safe).
    dot = lambda x, w_ref: jnp.dot(x.astype(bf16), w_ref[...],
                                   preferred_element_type=f32)

    # Packed constants (one DMA stream): biases + LayerNorm scale/shift.
    ent_b = consts[0:1, 0:d_pad]
    gcn_bk = consts[1:2, 0:h_pad]      # K * gcn_bias (linearity of the K-sum)
    rs_b = consts[2:3, 0:d_pad]
    p1_b = consts[3:4, 0:p1_pad]
    p2_b = consts[4:5, 0:d_pad]
    ln_g = consts[5:6, 0:d_pad]
    ln_b = consts[6:7, 0:d_pad]

    # entity_encoder: tanh([fc1(e1) || fc2(e2)]) via a block-diagonal weight.
    ent = jnp.tanh(dot(ent_cat[...], ent_w) + ent_b)                    # (T, Dp)

    # neighbor_encoder on pre-summed neighbor embeddings:
    #   tanh((sum_k emb_k @ W_gcn + K * b_gcn) * (1/degree))   (exact reciprocal)
    inv = inv_deg[...]                                                  # (T, 2) f32
    left = jnp.tanh((dot(nb_l[...], gcn_w) + gcn_bk) * inv[:, 0:1])    # (T, Hp)
    right = jnp.tanh((dot(nb_r[...], gcn_w) + gcn_bk) * inv[:, 1:2])   # (T, Hp)

    # reshape_layer with the [left | entity | right] concat folded into split weights.
    r = dot(left, rs_wl) + dot(ent, rs_we) + dot(right, rs_wr) + rs_b  # (T, Dp)

    # SupportEncoder: relu(proj1) -> proj2 -> residual -> LayerNorm.
    h = jnp.maximum(dot(r, p1_w) + p1_b, 0.0)                          # (T, P1p)
    y = dot(h, p2_w) + p2_b + r                                        # (T, Dp)

    # Masked two-pass LayerNorm over the true feature width d_real
    # (padded lanes of y are exactly zero by construction).
    lane = jax.lax.broadcasted_iota(jnp.int32, y.shape, 1)
    mask = (lane < d_real).astype(f32)
    inv_d = 1.0 / d_real
    mu = jnp.sum(y, axis=-1, keepdims=True) * inv_d
    d = (y - mu) * mask
    var = jnp.sum(d * d, axis=-1, keepdims=True) * inv_d
    g_out[...] = d * jax.lax.rsqrt(var + LN_EPS) * ln_g + ln_b


# --------------------------------------------------------------------------- #
# Parameter init (deterministic, synthetic) — mirrors the torch module layout.
# --------------------------------------------------------------------------- #
def init_params(key, embed_dim, num_symbols):
    D, H = embed_dim, embed_dim // 2
    ks = jax.random.split(key, 8)

    def lin(k, fan_in, fan_out):
        kw, kb = jax.random.split(k)
        scale = 1.0 / jnp.sqrt(jnp.float32(fan_in))
        w = jax.random.uniform(kw, (fan_out, fan_in), jnp.float32, -scale, scale)
        b = jax.random.uniform(kb, (fan_out,), jnp.float32, -scale, scale)
        return w, b

    emb = jax.random.normal(ks[0], (num_symbols + 1, D), jnp.float32) * 0.1
    emb = emb.at[num_symbols].set(0.0)  # padding_idx row is zero

    fc1_w, fc1_b = lin(ks[1], D, H)
    fc2_w, fc2_b = lin(ks[2], D, H)
    gcn_w, gcn_b = lin(ks[3], D, H)        # gcn_b here is the Linear's bias
    rs_w, rs_b = lin(ks[4], 2 * D, D)      # reshape_layer: 2D -> D
    p1_w, p1_b = lin(ks[5], D, 2 * D)      # SupportEncoder proj1
    p2_w, p2_b = lin(ks[6], 2 * D, D)      # SupportEncoder proj2
    ln_g = jnp.ones((D,), jnp.float32)
    ln_b = jnp.zeros((D,), jnp.float32)

    return dict(emb=emb, fc1_w=fc1_w, fc1_b=fc1_b, fc2_w=fc2_w, fc2_b=fc2_b,
                gcn_w=gcn_w, gcn_b=gcn_b, rs_w=rs_w, rs_b=rs_b,
                p1_w=p1_w, p1_b=p1_b, p2_w=p2_w, p2_b=p2_b,
                ln_g=ln_g, ln_b=ln_b)


# --------------------------------------------------------------------------- #
# One-time parameter preparation (hoisted out of the forward call).
# --------------------------------------------------------------------------- #
def prepare_params(params, num_neighbors):
    D = params["emb"].shape[1]
    H = D // 2
    Dp = _round_up(D, LANE)
    Hp = _round_up(H, LANE)
    P1p = _round_up(2 * D, LANE)
    K = int(num_neighbors)

    wt = jnp.transpose
    f32, bf16 = jnp.float32, jnp.bfloat16

    def pad2(a, r, c):
        return jnp.pad(a, ((0, r - a.shape[0]), (0, c - a.shape[1])))

    def pad1(a, n):
        return jnp.pad(a, (0, n - a.shape[0]))

    # Embedding table padded to lane-dense width (padded lanes zero).
    emb = pad2(params["emb"], params["emb"].shape[0], Dp)

    # Block-diagonal entity weight: [e1 || e2] @ W_blk == [fc1(e1) || fc2(e2)].
    ent_w = jnp.zeros((2 * Dp, Dp), f32)
    ent_w = ent_w.at[:D, :H].set(wt(params["fc1_w"]))
    ent_w = ent_w.at[Dp:Dp + D, H:D].set(wt(params["fc2_w"]))
    ent_b = pad1(jnp.concatenate([params["fc1_b"], params["fc2_b"]]), Dp)

    gcn_w = pad2(wt(params["gcn_w"]), Dp, Hp)
    gcn_bk = pad1(params["gcn_b"] * jnp.float32(K), Hp)

    # reshape_layer weight split matching the [left | entity | right] concat order.
    rs_wt = wt(params["rs_w"])                          # (2D, D)
    rs_wl = pad2(rs_wt[:H], Hp, Dp)
    rs_we = pad2(rs_wt[H:H + D], Dp, Dp)
    rs_wr = pad2(rs_wt[H + D:], Hp, Dp)
    rs_b = pad1(params["rs_b"], Dp)

    p1_w = pad2(wt(params["p1_w"]), Dp, P1p)
    p1_b = pad1(params["p1_b"], P1p)
    p2_w = pad2(wt(params["p2_w"]), P1p, Dp)
    p2_b = pad1(params["p2_b"], Dp)
    ln_g = pad1(params["ln_g"], Dp)
    ln_b = pad1(params["ln_b"], Dp)

    wmax = max(Dp, Hp, P1p)
    rowpad = lambda v: pad1(v, wmax)
    consts = jnp.stack(
        [rowpad(ent_b), rowpad(gcn_bk), rowpad(rs_b), rowpad(p1_b),
         rowpad(p2_b), rowpad(ln_g), rowpad(ln_b), jnp.zeros((wmax,), f32)],
        axis=0)                                         # (8, wmax), one DMA stream

    return dict(
        emb=emb,
        ent_w=ent_w.astype(bf16), gcn_w=gcn_w.astype(bf16),
        rs_wl=rs_wl.astype(bf16), rs_we=rs_we.astype(bf16),
        rs_wr=rs_wr.astype(bf16),
        p1_w=p1_w.astype(bf16), p2_w=p2_w.astype(bf16),
        consts=consts,
        D=D, Dp=Dp, Hp=Hp, P1p=P1p, K=K,
    )


# --------------------------------------------------------------------------- #
# Forward: gathers + K-pre-reduction (XLA glue) + single fused pallas_call.
# --------------------------------------------------------------------------- #
def extractor_forward(prep, query, support, query_meta, support_meta):
    emb = prep["emb"]                                   # (V, Dp) f32, lane-dense
    D, Dp, Hp, P1p = prep["D"], prep["Dp"], prep["Hp"], prep["P1p"]
    B = query.shape[0]
    F = support.shape[0]
    N = B + F

    q_l_conn, q_l_deg, q_r_conn, q_r_deg = query_meta
    s_l_conn, s_l_deg, s_r_conn, s_r_deg = support_meta

    gather = lambda idx: jnp.take(emb, idx, axis=0)

    # Stack query + support rows into one batch (single pass through every layer).
    pairs = jnp.concatenate([query, support], axis=0)                   # (N, 2)
    ent_cat = jnp.concatenate([gather(pairs[:, 0]), gather(pairs[:, 1])], axis=-1)

    # Pre-reduce neighbor embeddings over K in f32 (the GCN linear commutes with
    # the sum) so only (N, Dp) enters the kernel.
    # TODO(synk): production K~200 -> in-kernel scalar-prefetch DMA gather.
    def nb_sum(qc, sc):
        conn = jnp.concatenate([qc[:, :, 1], sc[:, :, 1]], axis=0)      # (N, K)
        return jnp.sum(gather(conn), axis=1)                            # (N, Dp)

    nb_l = nb_sum(q_l_conn, s_l_conn)
    nb_r = nb_sum(q_r_conn, s_r_conn)

    # Exact reciprocal of the degrees, both sides merged into one (N, 2) block.
    deg = jnp.stack([jnp.concatenate([q_l_deg, s_l_deg]),
                     jnp.concatenate([q_r_deg, s_r_deg])],
                    axis=1).astype(jnp.float32)                         # (N, 2)
    inv_deg = 1.0 / deg

    # Row padding / tiling.
    tile = _pick_row_tile(N)
    Np = _round_up(N, tile)
    pad = Np - N
    padrows = lambda x, cv=0.0: jnp.pad(x, ((0, pad), (0, 0)), constant_values=cv)
    ent_cat = padrows(ent_cat).astype(jnp.bfloat16)
    nb_l = padrows(nb_l).astype(jnp.bfloat16)
    nb_r = padrows(nb_r).astype(jnp.bfloat16)
    inv_deg = padrows(inv_deg, 1.0)       # padded degrees -> finite values

    row_spec = lambda width: pl.BlockSpec((tile, width), lambda i: (i, 0))
    full_spec = lambda a: pl.BlockSpec(a.shape, lambda i: (0, 0))

    weights = (prep["ent_w"], prep["gcn_w"], prep["rs_wl"], prep["rs_we"],
               prep["rs_wr"], prep["p1_w"], prep["p2_w"], prep["consts"])

    kernel = partial(_extractor_kernel, d_real=D, d_pad=Dp, h_pad=Hp, p1_pad=P1p)

    g = pl.pallas_call(
        kernel,
        out_shape=jax.ShapeDtypeStruct((Np, Dp), jnp.float32),
        grid=(Np // tile,),
        in_specs=[row_spec(2 * Dp), row_spec(Dp), row_spec(Dp), row_spec(2)]
                 + [full_spec(a) for a in weights],
        out_specs=pl.BlockSpec((tile, Dp), lambda i: (i, 0)),
        compiler_params=pltpu.CompilerParams(
            dimension_semantics=("parallel",)),   # v7x: shard row tiles over both TCs
    )(ent_cat, nb_l, nb_r, inv_deg, *weights)

    g = g[:, :D]                                                        # drop lane padding
    query_g = g[:B]                                                     # (B, D)
    support_g = jnp.mean(g[B:N], axis=0, keepdims=True)                 # (1, D)
    scores = (query_g @ support_g.T)[:, 0]                              # (B,)
    return query_g, scores


# --------------------------------------------------------------------------- #
# Pure-JAX reference (original module semantics) for the correctness check.
# --------------------------------------------------------------------------- #
def reference_forward(params, query, support, query_meta, support_meta):
    emb = params["emb"]
    gather = lambda idx: jnp.take(emb, idx, axis=0)
    lin = lambda x, w, b: x @ w.T + b

    def entity_enc(e1, e2):
        return jnp.tanh(jnp.concatenate(
            [lin(e1, params["fc1_w"], params["fc1_b"]),
             lin(e2, params["fc2_w"], params["fc2_b"])], axis=-1))

    def neigh_enc(conn, degrees):
        e = gather(conn[:, :, 1])                                       # (N, K, D)
        h = jnp.einsum("nkd,hd->nkh", e, params["gcn_w"]) + params["gcn_b"]
        out = jnp.sum(h, axis=1) / degrees.astype(jnp.float32)[:, None]
        return jnp.tanh(out)

    def support_encoder(x):
        h = jnp.maximum(lin(x, params["p1_w"], params["p1_b"]), 0.0)
        h = lin(h, params["p2_w"], params["p2_b"])
        y = h + x
        mu = jnp.mean(y, axis=-1, keepdims=True)
        var = jnp.mean((y - mu) ** 2, axis=-1, keepdims=True)
        return (y - mu) / jnp.sqrt(var + LN_EPS) * params["ln_g"] + params["ln_b"]

    q_l_conn, q_l_deg, q_r_conn, q_r_deg = query_meta
    s_l_conn, s_l_deg, s_r_conn, s_r_deg = support_meta

    query_e = entity_enc(gather(query[:, 0]), gather(query[:, 1]))
    support_e = entity_enc(gather(support[:, 0]), gather(support[:, 1]))

    qn = jnp.concatenate([neigh_enc(q_l_conn, q_l_deg), query_e,
                          neigh_enc(q_r_conn, q_r_deg)], axis=-1)
    sn = jnp.concatenate([neigh_enc(s_l_conn, s_l_deg), support_e,
                          neigh_enc(s_r_conn, s_r_deg)], axis=-1)

    query_g = support_encoder(lin(qn, params["rs_w"], params["rs_b"]))
    support_g = support_encoder(lin(sn, params["rs_w"], params["rs_b"]))
    support_g = jnp.mean(support_g, axis=0, keepdims=True)
    scores = (query_g @ support_g.T)[:, 0]
    return query_g, scores


# --------------------------------------------------------------------------- #
if __name__ == "__main__":
    D = 32            # embed_dim
    NUM_SYMBOLS = 20
    B = 4             # query batch
    FEW = 2           # support size
    K = 8             # neighbors per entity (200 in the original module)

    key = jax.random.PRNGKey(0)
    kp, kq, ks, kqm, ksm = jax.random.split(key, 5)
    params = init_params(kp, D, NUM_SYMBOLS)

    query = jax.random.randint(kq, (B, 2), 0, NUM_SYMBOLS, dtype=jnp.int32)
    support = jax.random.randint(ks, (FEW, 2), 0, NUM_SYMBOLS, dtype=jnp.int32)

    def make_meta(k, n):
        ka, kb, kc, kd = jax.random.split(k, 4)
        left_conn = jax.random.randint(ka, (n, K, 2), 0, NUM_SYMBOLS + 1, dtype=jnp.int32)
        left_deg = jax.random.randint(kb, (n,), 1, K + 1).astype(jnp.float32)
        right_conn = jax.random.randint(kc, (n, K, 2), 0, NUM_SYMBOLS + 1, dtype=jnp.int32)
        right_deg = jax.random.randint(kd, (n,), 1, K + 1).astype(jnp.float32)
        return (left_conn, left_deg, right_conn, right_deg)

    query_meta = make_meta(kqm, B)
    support_meta = make_meta(ksm, FEW)

    # One-time weight assembly (hoisted out of the forward call).
    prep = prepare_params(params, K)

    query_g, scores = extractor_forward(prep, query, support, query_meta, support_meta)
    jax.block_until_ready((query_g, scores))

    ref_qg, ref_sc = reference_forward(params, query, support, query_meta, support_meta)
    assert query_g.shape == (B, D) and scores.shape == (B,)
    # 2e-2 tolerance: the kernel feeds bf16 operands to the MXU (f32 accumulate);
    # the f32 reference at default TPU matmul precision is internally bf16-pass as
    # well, so differences come only from the explicit activation casts.
    assert jnp.allclose(query_g, ref_qg, atol=2e-2, rtol=2e-2)
    assert jnp.allclose(scores, ref_sc, atol=2e-2, rtol=2e-2)

    print("KERNEL_OK")
</pallas_src>

<mosaic_0001>
module attributes {stable_mosaic.version = 11 : i64} {
  func.func @_extractor_kernel(%arg0: i32, %arg1: memref<16x256xbf16, #tpu.memory_space<vmem>>, %arg2: memref<16x128xbf16, #tpu.memory_space<vmem>>, %arg3: memref<16x128xbf16, #tpu.memory_space<vmem>>, %arg4: memref<16x2xf32, #tpu.memory_space<vmem>>, %arg5: memref<256x128xbf16, #tpu.memory_space<vmem>>, %arg6: memref<128x128xbf16, #tpu.memory_space<vmem>>, %arg7: memref<128x128xbf16, #tpu.memory_space<vmem>>, %arg8: memref<128x128xbf16, #tpu.memory_space<vmem>>, %arg9: memref<128x128xbf16, #tpu.memory_space<vmem>>, %arg10: memref<128x128xbf16, #tpu.memory_space<vmem>>, %arg11: memref<128x128xbf16, #tpu.memory_space<vmem>>, %arg12: memref<8x128xf32, #tpu.memory_space<vmem>>, %arg13: memref<16x128xf32, #tpu.memory_space<vmem>>) attributes {dimension_semantics = [#tpu.dimension_semantics<parallel>], iteration_bounds = array<i64: 1>, scalar_prefetch = 0 : i64, scratch_operands = 0 : i64, tpu.core_type = #tpu.core_type<tc>, window_params = [{transform_indices = @transform_0, window_bounds = array<i64: 16, 256>}, {transform_indices = @transform_1, window_bounds = array<i64: 16, 128>}, {transform_indices = @transform_2, window_bounds = array<i64: 16, 128>}, {transform_indices = @transform_3, window_bounds = array<i64: 16, 2>}, {pipeline_mode = #tpu.pipeline_mode<synchronous>, transform_indices = @transform_4, window_bounds = array<i64: 256, 128>}, {pipeline_mode = #tpu.pipeline_mode<synchronous>, transform_indices = @transform_5, window_bounds = array<i64: 128, 128>}, {pipeline_mode = #tpu.pipeline_mode<synchronous>, transform_indices = @transform_6, window_bounds = array<i64: 128, 128>}, {pipeline_mode = #tpu.pipeline_mode<synchronous>, transform_indices = @transform_7, window_bounds = array<i64: 128, 128>}, {pipeline_mode = #tpu.pipeline_mode<synchronous>, transform_indices = @transform_8, window_bounds = array<i64: 128, 128>}, {pipeline_mode = #tpu.pipeline_mode<synchronous>, transform_indices = @transform_9, window_bounds = array<i64: 128, 128>}, {pipeline_mode = #tpu.pipeline_mode<synchronous>, transform_indices = @transform_10, window_bounds = array<i64: 128, 128>}, {pipeline_mode = #tpu.pipeline_mode<synchronous>, transform_indices = @transform_11, window_bounds = array<i64: 8, 128>}, {transform_indices = @transform_12, window_bounds = array<i64: 16, 128>}]} {
    %c0 = arith.constant 0 : index
    %c0_0 = arith.constant 0 : index
    %0 = vector.load %arg12[%c0, %c0_0] : memref<8x128xf32, #tpu.memory_space<vmem>>, vector<1x128xf32>
    %c1 = arith.constant 1 : index
    %c0_1 = arith.constant 0 : index
    %1 = vector.load %arg12[%c1, %c0_1] : memref<8x128xf32, #tpu.memory_space<vmem>>, vector<1x128xf32>
    %c2 = arith.constant 2 : index
    %c0_2 = arith.constant 0 : index
    %2 = vector.load %arg12[%c2, %c0_2] : memref<8x128xf32, #tpu.memory_space<vmem>>, vector<1x128xf32>
    %c3 = arith.constant 3 : index
    %c0_3 = arith.constant 0 : index
    %3 = vector.load %arg12[%c3, %c0_3] : memref<8x128xf32, #tpu.memory_space<vmem>>, vector<1x128xf32>
    %c4 = arith.constant 4 : index
    %c0_4 = arith.constant 0 : index
    %4 = vector.load %arg12[%c4, %c0_4] : memref<8x128xf32, #tpu.memory_space<vmem>>, vector<1x128xf32>
    %c5 = arith.constant 5 : index
    %c0_5 = arith.constant 0 : index
    %5 = vector.load %arg12[%c5, %c0_5] : memref<8x128xf32, #tpu.memory_space<vmem>>, vector<1x128xf32>
    %c6 = arith.constant 6 : index
    %c0_6 = arith.constant 0 : index
    %6 = vector.load %arg12[%c6, %c0_6] : memref<8x128xf32, #tpu.memory_space<vmem>>, vector<1x128xf32>
    %c0_7 = arith.constant 0 : index
    %c0_8 = arith.constant 0 : index
    %7 = vector.load %arg1[%c0_7, %c0_8] : memref<16x256xbf16, #tpu.memory_space<vmem>>, vector<16x256xbf16>
    %c0_9 = arith.constant 0 : index
    %c0_10 = arith.constant 0 : index
    %8 = vector.load %arg5[%c0_9, %c0_10] : memref<256x128xbf16, #tpu.memory_space<vmem>>, vector<256x128xbf16>
    %cst = arith.constant dense<0.000000e+00> : vector<16x128xf32>
    %9 = tpu.matmul %7, %8, %cst {dimension_numbers = #tpu.dot_dimension_numbers<[1], [0], [0], [1], [0, 0, 1, 1], [], []>} : vector<16x256xbf16>, vector<256x128xbf16>, vector<16x128xf32> -> vector<16x128xf32>
    %10 = vector.broadcast %0 : vector<1x128xf32> to vector<16x128xf32>
    %11 = arith.addf %9, %10 : vector<16x128xf32>
    %12 = math.tanh %11 : vector<16x128xf32>
    %c0_11 = arith.constant 0 : index
    %c0_12 = arith.constant 0 : index
    %13 = vector.load %arg4[%c0_11, %c0_12] : memref<16x2xf32, #tpu.memory_space<vmem>>, vector<16x2xf32>
    %c0_13 = arith.constant 0 : index
    %c0_14 = arith.constant 0 : index
    %14 = vector.load %arg2[%c0_13, %c0_14] : memref<16x128xbf16, #tpu.memory_space<vmem>>, vector<16x128xbf16>
    %c0_15 = arith.constant 0 : index
    %c0_16 = arith.constant 0 : index
    %15 = vector.load %arg6[%c0_15, %c0_16] : memref<128x128xbf16, #tpu.memory_space<vmem>>, vector<128x128xbf16>
    %cst_17 = arith.constant dense<0.000000e+00> : vector<16x128xf32>
    %16 = tpu.matmul %14, %15, %cst_17 {dimension_numbers = #tpu.dot_dimension_numbers<[1], [0], [0], [1], [0, 0, 1, 1], [], []>} : vector<16x128xbf16>, vector<128x128xbf16>, vector<16x128xf32> -> vector<16x128xf32>
    %17 = vector.broadcast %1 : vector<1x128xf32> to vector<16x128xf32>
    %18 = arith.addf %16, %17 : vector<16x128xf32>
    %19 = vector.extract_strided_slice %13 {offsets = [0, 0], sizes = [16, 1], strides = [1, 1]} : vector<16x2xf32> to vector<16x1xf32>
    %20 = vector.broadcast %19 : vector<16x1xf32> to vector<16x128xf32>
    %21 = arith.mulf %18, %20 : vector<16x128xf32>
    %22 = math.tanh %21 : vector<16x128xf32>
    %c0_18 = arith.constant 0 : index
    %c0_19 = arith.constant 0 : index
    %23 = vector.load %arg3[%c0_18, %c0_19] : memref<16x128xbf16, #tpu.memory_space<vmem>>, vector<16x128xbf16>
    %c0_20 = arith.constant 0 : index
    %c0_21 = arith.constant 0 : index
    %24 = vector.load %arg6[%c0_20, %c0_21] : memref<128x128xbf16, #tpu.memory_space<vmem>>, vector<128x128xbf16>
    %cst_22 = arith.constant dense<0.000000e+00> : vector<16x128xf32>
    %25 = tpu.matmul %23, %24, %cst_22 {dimension_numbers = #tpu.dot_dimension_numbers<[1], [0], [0], [1], [0, 0, 1, 1], [], []>} : vector<16x128xbf16>, vector<128x128xbf16>, vector<16x128xf32> -> vector<16x128xf32>
    %26 = vector.broadcast %1 : vector<1x128xf32> to vector<16x128xf32>
    %27 = arith.addf %25, %26 : vector<16x128xf32>
    %28 = vector.extract_strided_slice %13 {offsets = [0, 1], sizes = [16, 1], strides = [1, 1]} : vector<16x2xf32> to vector<16x1xf32>
    %29 = vector.broadcast %28 : vector<16x1xf32> to vector<16x128xf32>
    %30 = arith.mulf %27, %29 : vector<16x128xf32>
    %31 = math.tanh %30 : vector<16x128xf32>
    %32 = arith.truncf %22 : vector<16x128xf32> to vector<16x128xbf16>
    %c0_23 = arith.constant 0 : index
    %c0_24 = arith.constant 0 : index
    %33 = vector.load %arg7[%c0_23, %c0_24] : memref<128x128xbf16, #tpu.memory_space<vmem>>, vector<128x128xbf16>
    %cst_25 = arith.constant dense<0.000000e+00> : vector<16x128xf32>
    %34 = tpu.matmul %32, %33, %cst_25 {dimension_numbers = #tpu.dot_dimension_numbers<[1], [0], [0], [1], [0, 0, 1, 1], [], []>} : vector<16x128xbf16>, vector<128x128xbf16>, vector<16x128xf32> -> vector<16x128xf32>
    %35 = arith.truncf %12 : vector<16x128xf32> to vector<16x128xbf16>
    %c0_26 = arith.constant 0 : index
    %c0_27 = arith.constant 0 : index
    %36 = vector.load %arg8[%c0_26, %c0_27] : memref<128x128xbf16, #tpu.memory_space<vmem>>, vector<128x128xbf16>
    %cst_28 = arith.constant dense<0.000000e+00> : vector<16x128xf32>
    %37 = tpu.matmul %35, %36, %cst_28 {dimension_numbers = #tpu.dot_dimension_numbers<[1], [0], [0], [1], [0, 0, 1, 1], [], []>} : vector<16x128xbf16>, vector<128x128xbf16>, vector<16x128xf32> -> vector<16x128xf32>
    %38 = arith.addf %34, %37 : vector<16x128xf32>
    %39 = arith.truncf %31 : vector<16x128xf32> to vector<16x128xbf16>
    %c0_29 = arith.constant 0 : index
    %c0_30 = arith.constant 0 : index
    %40 = vector.load %arg9[%c0_29, %c0_30] : memref<128x128xbf16, #tpu.memory_space<vmem>>, vector<128x128xbf16>
    %cst_31 = arith.constant dense<0.000000e+00> : vector<16x128xf32>
    %41 = tpu.matmul %39, %40, %cst_31 {dimension_numbers = #tpu.dot_dimension_numbers<[1], [0], [0], [1], [0, 0, 1, 1], [], []>} : vector<16x128xbf16>, vector<128x128xbf16>, vector<16x128xf32> -> vector<16x128xf32>
    %42 = arith.addf %38, %41 : vector<16x128xf32>
    %43 = vector.broadcast %2 : vector<1x128xf32> to vector<16x128xf32>
    %44 = arith.addf %42, %43 : vector<16x128xf32>
    %45 = arith.truncf %44 : vector<16x128xf32> to vector<16x128xbf16>
    %c0_32 = arith.constant 0 : index
    %c0_33 = arith.constant 0 : index
    %46 = vector.load %arg10[%c0_32, %c0_33] : memref<128x128xbf16, #tpu.memory_space<vmem>>, vector<128x128xbf16>
    %cst_34 = arith.constant dense<0.000000e+00> : vector<16x128xf32>
    %47 = tpu.matmul %45, %46, %cst_34 {dimension_numbers = #tpu.dot_dimension_numbers<[1], [0], [0], [1], [0, 0, 1, 1], [], []>} : vector<16x128xbf16>, vector<128x128xbf16>, vector<16x128xf32> -> vector<16x128xf32>
    %48 = vector.broadcast %3 : vector<1x128xf32> to vector<16x128xf32>
    %49 = arith.addf %47, %48 : vector<16x128xf32>
    %cst_35 = arith.constant 0.000000e+00 : f32
    %50 = vector.broadcast %cst_35 : f32 to vector<16x128xf32>
    %51 = arith.maximumf %49, %50 : vector<16x128xf32>
    %52 = arith.truncf %51 : vector<16x128xf32> to vector<16x128xbf16>
    %c0_36 = arith.constant 0 : index
    %c0_37 = arith.constant 0 : index
    %53 = vector.load %arg11[%c0_36, %c0_37] : memref<128x128xbf16, #tpu.memory_space<vmem>>, vector<128x128xbf16>
    %cst_38 = arith.constant dense<0.000000e+00> : vector<16x128xf32>
    %54 = tpu.matmul %52, %53, %cst_38 {dimension_numbers = #tpu.dot_dimension_numbers<[1], [0], [0], [1], [0, 0, 1, 1], [], []>} : vector<16x128xbf16>, vector<128x128xbf16>, vector<16x128xf32> -> vector<16x128xf32>
    %55 = vector.broadcast %4 : vector<1x128xf32> to vector<16x128xf32>
    %56 = arith.addf %54, %55 : vector<16x128xf32>
    %57 = arith.addf %56, %44 : vector<16x128xf32>
    %58 = tpu.iota {dimensions = array<i32: 1>} : vector<16x128xi32>
    %c32_i32 = arith.constant 32 : i32
    %59 = vector.broadcast %c32_i32 : i32 to vector<16x128xi32>
    %60 = arith.cmpi slt, %58, %59 : vector<16x128xi32>
    %61 = arith.extui %60 : vector<16x128xi1> to vector<16x128xi32>
    %62 = arith.sitofp %61 : vector<16x128xi32> to vector<16x128xf32>
    %cst_39 = arith.constant dense<0.000000e+00> : vector<16xf32>
    %63 = vector.multi_reduction <add>, %57, %cst_39 [1] : vector<16x128xf32> to vector<16xf32>
    %64 = vector.shape_cast %63 : vector<16xf32> to vector<16x1xf32>
    %cst_40 = arith.constant 3.125000e-02 : f32
    %65 = vector.broadcast %cst_40 : f32 to vector<16x1xf32>
    %66 = arith.mulf %64, %65 : vector<16x1xf32>
    %67 = vector.broadcast %66 : vector<16x1xf32> to vector<16x128xf32>
    %68 = arith.subf %57, %67 : vector<16x128xf32>
    %69 = arith.mulf %68, %62 : vector<16x128xf32>
    %70 = arith.mulf %69, %69 : vector<16x128xf32>
    %cst_41 = arith.constant dense<0.000000e+00> : vector<16xf32>
    %71 = vector.multi_reduction <add>, %70, %cst_41 [1] : vector<16x128xf32> to vector<16xf32>
    %72 = vector.shape_cast %71 : vector<16xf32> to vector<16x1xf32>
    %cst_42 = arith.constant 3.125000e-02 : f32
    %73 = vector.broadcast %cst_42 : f32 to vector<16x1xf32>
    %74 = arith.mulf %72, %73 : vector<16x1xf32>
    %cst_43 = arith.constant 9.99999974E-6 : f32
    %75 = vector.broadcast %cst_43 : f32 to vector<16x1xf32>
    %76 = arith.addf %74, %75 : vector<16x1xf32>
    %77 = math.rsqrt %76 : vector<16x1xf32>
    %78 = vector.broadcast %77 : vector<16x1xf32> to vector<16x128xf32>
    %79 = arith.mulf %69, %78 : vector<16x128xf32>
    %80 = vector.broadcast %5 : vector<1x128xf32> to vector<16x128xf32>
    %81 = arith.mulf %79, %80 : vector<16x128xf32>
    %82 = vector.broadcast %6 : vector<1x128xf32> to vector<16x128xf32>
    %83 = arith.addf %81, %82 : vector<16x128xf32>
    %c0_44 = arith.constant 0 : index
    %c0_45 = arith.constant 0 : index
    %84 = vector.load %arg13[%c0_44, %c0_45] : memref<16x128xf32, #tpu.memory_space<vmem>>, vector<16x128xf32>
    tpu.vector_store %arg13[%c0_44, %c0_45], %83 {strides = array<i32>} : memref<16x128xf32, #tpu.memory_space<vmem>>, vector<16x128xf32>,
    return
  }
  func.func @transform_0(%arg0: i32) -> (i32, i32) {
    %c0_i32 = arith.constant 0 : i32
    %c0_i32_0 = arith.constant 0 : i32
    return %arg0, %c0_i32 : i32, i32
  }
  func.func @transform_1(%arg0: i32) -> (i32, i32) {
    %c0_i32 = arith.constant 0 : i32
    %c0_i32_0 = arith.constant 0 : i32
    return %arg0, %c0_i32 : i32, i32
  }
  func.func @transform_2(%arg0: i32) -> (i32, i32) {
    %c0_i32 = arith.constant 0 : i32
    %c0_i32_0 = arith.constant 0 : i32
    return %arg0, %c0_i32 : i32, i32
  }
  func.func @transform_3(%arg0: i32) -> (i32, i32) {
    %c0_i32 = arith.constant 0 : i32
    %c0_i32_0 = arith.constant 0 : i32
    return %arg0, %c0_i32 : i32, i32
  }
  func.func @transform_4(%arg0: i32) -> (i32, i32) {
    %c0_i32 = arith.constant 0 : i32
    %c0_i32_0 = arith.constant 0 : i32
    %c0_i32_1 = arith.constant 0 : i32
    return %c0_i32, %c0_i32_0 : i32, i32
  }
  func.func @transform_5(%arg0: i32) -> (i32, i32) {
    %c0_i32 = arith.constant 0 : i32
    %c0_i32_0 = arith.constant 0 : i32
    %c0_i32_1 = arith.constant 0 : i32
    return %c0_i32, %c0_i32_0 : i32, i32
  }
  func.func @transform_6(%arg0: i32) -> (i32, i32) {
    %c0_i32 = arith.constant 0 : i32
    %c0_i32_0 = arith.constant 0 : i32
    %c0_i32_1 = arith.constant 0 : i32
    return %c0_i32, %c0_i32_0 : i32, i32
  }
  func.func @transform_7(%arg0: i32) -> (i32, i32) {
    %c0_i32 = arith.constant 0 : i32
    %c0_i32_0 = arith.constant 0 : i32
    %c0_i32_1 = arith.constant 0 : i32
    return %c0_i32, %c0_i32_0 : i32, i32
  }
  func.func @transform_8(%arg0: i32) -> (i32, i32) {
    %c0_i32 = arith.constant 0 : i32
    %c0_i32_0 = arith.constant 0 : i32
    %c0_i32_1 = arith.constant 0 : i32
    return %c0_i32, %c0_i32_0 : i32, i32
  }
  func.func @transform_9(%arg0: i32) -> (i32, i32) {
    %c0_i32 = arith.constant 0 : i32
    %c0_i32_0 = arith.constant 0 : i32
    %c0_i32_1 = arith.constant 0 : i32
    return %c0_i32, %c0_i32_0 : i32, i32
  }
  func.func @transform_10(%arg0: i32) -> (i32, i32) {
    %c0_i32 = arith.constant 0 : i32
    %c0_i32_0 = arith.constant 0 : i32
    %c0_i32_1 = arith.constant 0 : i32
    return %c0_i32, %c0_i32_0 : i32, i32
  }
  func.func @transform_11(%arg0: i32) -> (i32, i32) {
    %c0_i32 = arith.constant 0 : i32
    %c0_i32_0 = arith.constant 0 : i32
    %c0_i32_1 = arith.constant 0 : i32
    return %c0_i32, %c0_i32_0 : i32, i32
  }
  func.func @transform_12(%arg0: i32) -> (i32, i32) {
    %c0_i32 = arith.constant 0 : i32
    %c0_i32_0 = arith.constant 0 : i32
    return %arg0, %c0_i32 : i32, i32
  }
}

</mosaic_0001>

<bundles_post_ra>
// kernel: tpu_custom_call.1
= control target key start
LH: loop header
LB: loop body
LE: loop exit
PB: predicated region body
PF: predicated region fallthrough
CT: control target
= control target key end

     0   :  { %17 = vsyncpa [#allocation3], 0  ;;  %s1794_s0 = inlined_call_operand.vmem [shape: bf16[16,256], index: 0, kind: input, shape index: {}]   ;;  %s1795_s1 = inlined_call_operand.hbm [shape: bf16[16,128], index: 1, kind: input, shape index: {}]   ;;  %s1796_s2 = inlined_call_operand.hbm [shape: bf16[16,128], index: 2, kind: input, shape index: {}]   ;;  %s1797_s3 = inlined_call_operand.vmem [shape: f32[16,2], index: 3, kind: input, shape index: {}]   ;;  %s1798_s4 = inlined_call_operand.hbm [shape: bf16[256,128], index: 4, kind: input, shape index: {}]   ;;  %s1799_s5 = inlined_call_operand.hbm [shape: bf16[128,128], index: 5, kind: input, shape index: {}]   ;;  %s1800_s6 = inlined_call_operand.hbm [shape: bf16[128,128], index: 6, kind: input, shape index: {}]   ;;  %s1801_s7 = inlined_call_operand.hbm [shape: bf16[128,128], index: 7, kind: input, shape index: {}]   ;;  %s1802_s8 = inlined_call_operand.hbm [shape: bf16[128,128], index: 8, kind: input, shape index: {}]   ;;  %s1803_s9 = inlined_call_operand.hbm [shape: bf16[128,128], index: 9, kind: input, shape index: {}]   ;;  %s1804_s10 = inlined_call_operand.hbm [shape: bf16[128,128], index: 10, kind: input, shape index: {}]   ;;  %s1805_s11 = inlined_call_operand.vmem [shape: f32[8,128], index: 11, kind: input, shape index: {}]   ;;  %s1806_s12 = inlined_call_operand.hbm [shape: f32[16,128], index: 12, kind: output, shape index: {}]  }
   0x1   :  { %18 = vsyncpa [#allocation6], 0 }
   0x2   :  { %19 = vsyncpa [#allocation9], 0 }
   0x3   :  { %20 = vsyncpa [#allocation12], 0 }
   0x4   :  { %21 = vsyncpa [#allocation15], 0 }
   0x5   :  { %22 = vsyncpa [#allocation4], 0  ;;  %s42_s23 = sshll.u32 %s1796_s2, 4  ;;  %s1616_s24 = smov [#allocation5]   ;;  %s43_s23 = int_to_ptr.hbm [resolvable:$true] %s42_s23 }
   0x6   :  { %s44_s25 = sshll.u32 %s1616_s24, 4  ;;  %s70_s28 = sshll.u32 %s1799_s5, 4  ;;  %s45_s25 = int_to_ptr.vmem [resolvable:$true] %s44_s25  ;;  %s71_s28 = int_to_ptr.hbm [resolvable:$true] %s70_s28 }
   0x7   :  { %s1617_s29 = smov 64   ;;  %s1618_s30 = smov 4  }
   0x8   :  { %50 = dma.hbm_to_vmem [thread:$0]  %s43_s23, 128, %s45_s25, [#allocation6], %s1617_s29, %s1617_s29, %s1618_s30  }
   0x9   :  { %s1619_s13 = smov [#allocation8]   ;;  %s96_s2 = sshll.u32 %s1801_s7, 4  ;;  %s97_s2 = int_to_ptr.hbm [resolvable:$true] %s96_s2 }
   0xa   :  { %s72_s14 = sshll.u32 %s1619_s13, 4  ;;  %s122_s18 = sshll.u32 %s1803_s9, 4  ;;  %s73_s14 = int_to_ptr.vmem [resolvable:$true] %s72_s14  ;;  %s123_s18 = int_to_ptr.hbm [resolvable:$true] %s122_s18 }
   0xb   :  { %78 = dma.hbm_to_vmem [thread:$0]  %s71_s28, 1024, %s73_s14, [#allocation9], %s1617_s29, %s1617_s29, %s1618_s30  }
   0xc   :  { %s1620_s19 = smov [#allocation11]   ;;  %s1621_s21 = smov [#allocation14]  }
   0xd   :  { %s98_s20 = sshll.u32 %s1620_s19, 4  ;;  %s124_s7 = sshll.u32 %s1621_s21, 4  ;;  %s99_s20 = int_to_ptr.vmem [resolvable:$true] %s98_s20  ;;  %s125_s7 = int_to_ptr.vmem [resolvable:$true] %s124_s7 }
   0xe   :  { %104 = dma.hbm_to_vmem [thread:$0]  %s97_s2, 1024, %s99_s20, [#allocation12], %s1617_s29, %s1617_s29, %s1618_s30  }
   0xf   :  { %s29_s24 = sshll.u32 %s1795_s1, 4  ;;  %s57_s26 = sshll.u32 %s1798_s4, 4  ;;  %s30_s24 = int_to_ptr.hbm [resolvable:$true] %s29_s24  ;;  %s58_s26 = int_to_ptr.hbm [resolvable:$true] %s57_s26 }
  0x10   :  { %130 = dma.hbm_to_vmem [thread:$0]  %s123_s18, 1024, %s125_s7, [#allocation15], %s1617_s29, %s1617_s29, %s1618_s30  }
  0x11   :  { %s1622_s27 = smov [#allocation2]   ;;  %s1623_s13 = smov [#allocation7]  }
  0x12   :  { %s31_s28 = sshll.u32 %s1622_s27, 4  ;;  %s59_s1 = sshll.u32 %s1623_s13, 4  ;;  %s32_s28 = int_to_ptr.vmem [resolvable:$true] %s31_s28  ;;  %s60_s1 = int_to_ptr.vmem [resolvable:$true] %s59_s1 }
  0x13   :  { %37 = dma.hbm_to_vmem [thread:$0]  %s30_s24, 128, %s32_s28, [#allocation3], %s1617_s29, %s1617_s29, %s1618_s30  }
  0x14   :  { %s83_s16 = sshll.u32 %s1800_s6, 4  ;;  %s109_s5 = sshll.u32 %s1802_s8, 4  ;;  %s84_s16 = int_to_ptr.hbm [resolvable:$true] %s83_s16  ;;  %s110_s5 = int_to_ptr.hbm [resolvable:$true] %s109_s5 }
  0x15   :  { %65 = dma.hbm_to_vmem [thread:$0]  %s58_s26, 2048, %s60_s1, [#allocation6], %s1617_s29, %s1617_s29, %s1618_s30  }
  0x16   :  { %s1624_s17 = smov [#allocation10]   ;;  %s1625_s19 = smov [#allocation13]  }
  0x17   :  { %s85_s18 = sshll.u32 %s1624_s17, 4  ;;  %s111_s6 = sshll.u32 %s1625_s19, 4  ;;  %s86_s18 = int_to_ptr.vmem [resolvable:$true] %s85_s18  ;;  %s112_s6 = int_to_ptr.vmem [resolvable:$true] %s111_s6 }
  0x18   :  { %91 = dma.hbm_to_vmem [thread:$0]  %s84_s16, 1024, %s86_s18, [#allocation9], %s1617_s29, %s1617_s29, %s1618_s30  }
  0x19   :  { %s135_s7 = sshll.u32 %s1804_s10, 4  ;;  %s1626_s8 = smov [#allocation16]   ;;  %s136_s7 = int_to_ptr.hbm [resolvable:$true] %s135_s7 }
  0x1a   :  { %117 = dma.hbm_to_vmem [thread:$0]  %s110_s5, 1024, %s112_s6, [#allocation12], %s1617_s29, %s1617_s29, %s1618_s30  }
  0x1b   :  { %s137_s22 = sshll.u32 %s1626_s8, 4  ;;  %s138_s22 = int_to_ptr.vmem [resolvable:$true] %s137_s22 }
  0x1c   :  { %143 = dma.hbm_to_vmem [thread:$0]  %s136_s7, 1024, %s138_s22, [#allocation15], %s1617_s29, %s1617_s29, %s1618_s30  }
  0x1d   :  { %1604 = dma.done.wait [#allocation3], 128  }
  0x1e   :  { %1605 = vsyncadd [#allocation3], 4294967168 }
  0x1f   :  { %1606 = dma.done.wait [#allocation6], 2176  }
  0x20   :  { %1607 = vsyncadd [#allocation6], 4294965120 }
  0x21   :  { %1608 = dma.done.wait [#allocation9], 2048  }
  0x22   :  { %1609 = vsyncadd [#allocation9], 4294965248 }
  0x23   :  { %1610 = dma.done.wait [#allocation12], 2048  }
  0x24   :  { %1611 = vsyncadd [#allocation12], 4294965248 }
  0x25   :  { %1612 = dma.done.wait [#allocation15], 2048  }
  0x26   :  { %1613 = vsyncadd [#allocation15], 4294965248  ;;  %v1263_v0 = vld [vmem:[#allocation7 + $0x38] sm:$0xff]  ;;  %v1262_v3 = vld [vmem:[#allocation7 + $0x30] sm:$0xff]  ;;  %v1627_v6 = vmov 1   ;;  %v1628_v7 = vmov 0  }
  0x27   :  { %v1280_v1 = vld [vmem:[#allocation8 + $0x38] sm:$0xff]  ;;  %330 = vmatpush.bf16.msra.mxu0 %v1263_v0  ;;  %v1279_v4 = vld [vmem:[#allocation8 + $0x30] sm:$0xff]  ;;  %1339 = vset.pattern.permute.xlu0 %v1627_v6  ;;  %v1261_v8 = vld [vmem:[#allocation7 + $0x28] sm:$0xff]  ;;  %s1630_s7 = smov [#allocation17]   ;;  %s964_s29 = sshll.u32 %s1806_s12, 4  ;;  %s965_s29 = int_to_ptr.hbm [resolvable:$true] %s964_s29 }
  0x28   :  { %v1271_v2 = vld [vmem:[#allocation7 + $0x78] sm:$0xff]  ;;  %435 = vmatpush.bf16.msra.mxu2 %v1280_v1  ;;  %471 = vmatpush.bf16.msra.mxu3 %v1280_v1  ;;  %v1270_v5 = vld [vmem:[#allocation7 + $0x70] sm:$0xff]  ;;  %v1278_v9 = vld [vmem:[#allocation8 + $0x28] sm:$0xff]  ;;  %s962_s8 = sshll.u32 %s1630_s7, 4  ;;  %s1632_s30 = smov 8   ;;  %s963_s8 = int_to_ptr.vmem [resolvable:$true] %s962_s8 }
  0x29   :  { %344 = vmatpush.bf16.msra.mxu1 %v1271_v2  ;;  %1340 = vset.pattern.permute.xlu1 %v1628_v7  ;;  %v1269_v10 = vld [vmem:[#allocation7 + $0x68] sm:$0xff]  ;;  %v1260_v11 = vld [vmem:[#allocation7 + $0x20] sm:$0xff]  ;;  %v360_v13 = vld [vmem:[%s1797_s3] sm:$0xff] }
  0x2a   :  { %v1277_v12 = vld [vmem:[#allocation8 + $0x20] sm:$0xff]  ;;  %v1259_v15 = vld [vmem:[#allocation7 + $0x18] sm:$0xff]  ;;  %486 = vperm.xlu0 %1339, %v360_v13   ;;  %451 = vperm.xlu1 %1340, %v360_v13   ;;  %v1258_v19 = vld [vmem:[#allocation7 + $0x10] sm:$0xff] }
  0x2b   :  { %331 = vmatpush.bf16.msra.mxu0 %v1262_v3  ;;  %v1268_v14 = vld [vmem:[#allocation7 + $0x60] sm:$0xff]  ;;  %v1276_v16 = vld [vmem:[#allocation8 + $0x18] sm:$0xff]  ;;  %v1275_v20 = vld [vmem:[#allocation8 + $0x10] sm:$0xff] }
  0x2c   :  { %436 = vmatpush.bf16.msra.mxu2 %v1279_v4  ;;  %472 = vmatpush.bf16.msra.mxu3 %v1279_v4  ;;  %v1267_v17 = vld [vmem:[#allocation7 + $0x58] sm:$0xff]  ;;  %v1266_v21 = vld [vmem:[#allocation7 + $0x50] sm:$0xff]  ;;  %v1257_v22 = vld [vmem:[#allocation7 + $0x8] sm:$0xff] }
  0x2d   :  { %345 = vmatpush.bf16.msra.mxu1 %v1270_v5  ;;  %v361_v18 = vld [vmem:[%s1797_s3 + $0x8] sm:$0xff]  ;;  %v1274_v23 = vld [vmem:[#allocation8 + $0x8] sm:$0xff]  ;;  %v1256_v25 = vld [vmem:[#allocation7] sm:$0xff] }
  0x2e   :  { %v1265_v24 = vld [vmem:[#allocation7 + $0x48] sm:$0xff]  ;;  %v1273_v26 = vld [vmem:[#allocation8] sm:$0xff]  ;;  %v983_v27 = vld [vmem:[%s1794_s0] sm:$0xf] }
  0x2f   :  { %332 = vmatpush.bf16.msra.mxu0 %v1261_v8  ;;  %v1255_v28 = vld [vmem:[%s1794_s0 + $0x4] sm:$0xf0]  ;;  %v1264_v29 = vld [vmem:[#allocation7 + $0x40] sm:$0xff]  ;;  %v1254_v30 = vld [vmem:[%s1794_s0 + $0x4] sm:$0xf] }
  0x30   :  { %437 = vmatpush.bf16.msra.mxu2 %v1278_v9  ;;  %473 = vmatpush.bf16.msra.mxu3 %v1278_v9  ;;  %v985_v31 = vld [vmem:[%s1794_s0 + $0x8] sm:$0xf0]  ;;  %v984_v34 = vor.u32 %v1255_v28, %v983_v27  ;;  %v1272_v35 = vld [vmem:[#allocation2] sm:$0xff]  ;;  %v1295_v40 = vld [vmem:[#allocation11 + $0x28] sm:$0xff] }
  0x31   :  { %346 = vmatpush.bf16.msra.mxu1 %v1269_v10  ;;  %v1297_v32 = vld [vmem:[#allocation11 + $0x38] sm:$0xff]  ;;  %v988_v37 = vor.u32 %v1254_v30, %v985_v31  ;;  %v1296_v39 = vld [vmem:[#allocation11 + $0x30] sm:$0xff]  ;;  %v1294_v43 = vld [vmem:[#allocation11 + $0x20] sm:$0xff] }
  0x32   :  { %490 = vperm.xlu0 %1339, %v361_v18   ;;  %456 = vperm.xlu1 %1340, %v361_v18   ;;  %v1289_v33 = vld [vmem:[#allocation10 + $0x38] sm:$0xff]  ;;  %v1288_v41 = vld [vmem:[#allocation10 + $0x30] sm:$0xff]  ;;  %v1287_v44 = vld [vmem:[#allocation10 + $0x28] sm:$0xff] }
  0x33   :  { %333 = vmatpush.bf16.msra.mxu0 %v1260_v11  ;;  %v1281_v36 = vld [vmem:[#allocation5] sm:$0xff]  ;;  %v1304_v42 = vld [vmem:[#allocation13 + $0x30] sm:$0xff]  ;;  %v1303_v45 = vld [vmem:[#allocation13 + $0x28] sm:$0xff] }
  0x34   :  { %438 = vmatpush.bf16.msra.mxu2 %v1277_v12  ;;  %474 = vmatpush.bf16.msra.mxu3 %v1277_v12  ;;  %v1305_v38 = vld [vmem:[#allocation13 + $0x38] sm:$0xff]  ;;  %v1286_v47 = vld [vmem:[#allocation10 + $0x20] sm:$0xff]  ;;  %v1292_v49 = vld [vmem:[#allocation11 + $0x10] sm:$0xff] }
  0x35   :  { %347 = vmatpush.bf16.msra.mxu1 %v1268_v14  ;;  %v1293_v46 = vld [vmem:[#allocation11 + $0x18] sm:$0xff]  ;;  %v1302_v48 = vld [vmem:[#allocation13 + $0x20] sm:$0xff]  ;;  %v1291_v52 = vld [vmem:[#allocation11 + $0x8] sm:$0xff] }
  0x36   :  { %v1285_v50 = vld [vmem:[#allocation10 + $0x18] sm:$0xff]  ;;  %v1284_v53 = vld [vmem:[#allocation10 + $0x10] sm:$0xff]  ;;  %v1290_v55 = vld [vmem:[#allocation11] sm:$0xff] }
  0x37   :  { %334 = vmatpush.bf16.msra.mxu0 %v1259_v15  ;;  %v1301_v51 = vld [vmem:[#allocation13 + $0x18] sm:$0xff]  ;;  %v1300_v54 = vld [vmem:[#allocation13 + $0x10] sm:$0xff]  ;;  %v1283_v56 = vld [vmem:[#allocation10 + $0x8] sm:$0xff] }
  0x38   :  { %439 = vmatpush.bf16.msra.mxu2 %v1276_v16  ;;  %475 = vmatpush.bf16.msra.mxu3 %v1276_v16  ;;  %v1299_v57 = vld [vmem:[#allocation13 + $0x8] sm:$0xff]  ;;  %v1282_v58 = vld [vmem:[#allocation10] sm:$0xff]  ;;  %v1313_v60 = vld [vmem:[#allocation14 + $0x38] sm:$0xff] }
  0x39   :  { %348 = vmatpush.bf16.msra.mxu1 %v1267_v17  ;;  %v1298_v59 = vld [vmem:[#allocation13] sm:$0xff]  ;;  %v1341_v61 = vld [vmem:[%s1805_s11] ss:$0 sm:$0xff]  ;;  %v1342_v2 = vld [vmem:[%s1805_s11 + $0x1] ss:$0 sm:$0xff] }
  0x3b   :  { %335 = vmatpush.bf16.msra.mxu0 %v1258_v19 }
  0x3c   :  { %440 = vmatpush.bf16.msra.mxu2 %v1275_v20  ;;  %476 = vmatpush.bf16.msra.mxu3 %v1275_v20 }
  0x3d   :  { %349 = vmatpush.bf16.msra.mxu1 %v1266_v21 }
  0x3f   :  { %336 = vmatpush.bf16.msra.mxu0 %v1257_v22 }
  0x40   :  { %441 = vmatpush.bf16.msra.mxu2 %v1274_v23  ;;  %477 = vmatpush.bf16.msra.mxu3 %v1274_v23 }
  0x41   :  { %350 = vmatpush.bf16.msra.mxu1 %v1265_v24 }
  0x43   :  { %337 = vmatpush.bf16.msra.mxu0 %v1256_v25 }
  0x44   :  { %442 = vmatpush.bf16.msra.mxu2 %v1273_v26  ;;  %478 = vmatpush.bf16.msra.mxu3 %v1273_v26 }
  0x45   :  { %351 = vmatpush.bf16.msra.mxu1 %v1264_v29 }
  0x46   :  { %338 = vmatmul.bf16.vlgmr.msra.gmra.mxu0 %v984_v34  ;;  %v1310_v34 = vld [vmem:[#allocation14 + $0x20] sm:$0xff] }
  0x47   :  { %579 = vmatpush.bf16.msrb.mxu0 %v1297_v32  ;;  %443 = vmatmul.bf16.vlgmr.msra.gmra.mxu2 %v1272_v35  ;;  %v1312_v32 = vld [vmem:[#allocation14 + $0x30] sm:$0xff]  ;;  %v1309_v35 = vld [vmem:[#allocation14 + $0x18] sm:$0xff] }
  0x48   :  { %479 = vmatmul.bf16.vlgmr.msra.gmra.mxu3 %v1281_v36  ;;  %352 = vmatmul.bf16.vlgmr.msra.gmra.mxu1 %v988_v37  ;;  %v1308_v36 = vld [vmem:[#allocation14 + $0x10] sm:$0xff]  ;;  %v1307_v37 = vld [vmem:[#allocation14 + $0x8] sm:$0xff] }
  0x49   :  { %641 = vmatpush.bf16.msrb.mxu1 %v1289_v33  ;;  %720 = vmatpush.bf16.msrb.mxu2 %v1305_v38  ;;  %v1311_v33 = vld [vmem:[#allocation14 + $0x28] sm:$0xff]  ;;  %v1306_v38 = vld [vmem:[#allocation14] sm:$0xff] }
  0x4a   :  { %805 = vmatpush.bf16.msrb.mxu3 %v1313_v60  ;;  %v1314_v60 = vld [vmem:[#allocation16] sm:$0xff] }
  0x4b   :  { %580 = vmatpush.bf16.msrb.mxu0 %v1296_v39  ;;  %v1321_v39 = vld [vmem:[#allocation16 + $0x38] sm:$0xff] }
  0x4d   :  { %642 = vmatpush.bf16.msrb.mxu1 %v1288_v41  ;;  %721 = vmatpush.bf16.msrb.mxu2 %v1304_v42  ;;  %v1319_v41 = vld [vmem:[#allocation16 + $0x28] sm:$0xff]  ;;  %v1318_v42 = vld [vmem:[#allocation16 + $0x20] sm:$0xff] }
  0x4e   :  { %806 = vmatpush.bf16.msrb.mxu3 %v1312_v32 }
  0x4f   :  { %581 = vmatpush.bf16.msrb.mxu0 %v1295_v40  ;;  %v1320_v40 = vld [vmem:[#allocation16 + $0x30] sm:$0xff] }
  0x51   :  { %643 = vmatpush.bf16.msrb.mxu1 %v1287_v44  ;;  %722 = vmatpush.bf16.msrb.mxu2 %v1303_v45 }
  0x52   :  { %807 = vmatpush.bf16.msrb.mxu3 %v1311_v33 }
  0x53   :  { %582 = vmatpush.bf16.msrb.mxu0 %v1294_v43 }
  0x55   :  { %644 = vmatpush.bf16.msrb.mxu1 %v1286_v47  ;;  %723 = vmatpush.bf16.msrb.mxu2 %v1302_v48 }
  0x56   :  { %808 = vmatpush.bf16.msrb.mxu3 %v1310_v34 }
  0x57   :  { %583 = vmatpush.bf16.msrb.mxu0 %v1293_v46 }
  0x59   :  { %645 = vmatpush.bf16.msrb.mxu1 %v1285_v50  ;;  %724 = vmatpush.bf16.msrb.mxu2 %v1301_v51  ;;  %v1343_v50 = vld [vmem:[%s1805_s11 + $0x2] ss:$0 sm:$0xff] }
  0x5a   :  { %809 = vmatpush.bf16.msrb.mxu3 %v1309_v35 }
  0x5b   :  { %584 = vmatpush.bf16.msrb.mxu0 %v1292_v49 }
  0x5d   :  { %646 = vmatpush.bf16.msrb.mxu1 %v1284_v53  ;;  %725 = vmatpush.bf16.msrb.mxu2 %v1300_v54 }
  0x5e   :  { %810 = vmatpush.bf16.msrb.mxu3 %v1308_v36 }
  0x5f   :  { %585 = vmatpush.bf16.msrb.mxu0 %v1291_v52 }
  0x61   :  { %647 = vmatpush.bf16.msrb.mxu1 %v1283_v56  ;;  %726 = vmatpush.bf16.msrb.mxu2 %v1299_v57  ;;  %v1317_v57 = vld [vmem:[#allocation16 + $0x18] sm:$0xff] }
  0x62   :  { %811 = vmatpush.bf16.msrb.mxu3 %v1307_v37 }
  0x63   :  { %586 = vmatpush.bf16.msrb.mxu0 %v1290_v55 }
  0x65   :  { %648 = vmatpush.bf16.msrb.mxu1 %v1282_v58  ;;  %727 = vmatpush.bf16.msrb.mxu2 %v1298_v59  ;;  %v1316_v58 = vld [vmem:[#allocation16 + $0x10] sm:$0xff]  ;;  %v1315_v59 = vld [vmem:[#allocation16 + $0x8] sm:$0xff] }
  0x66   :  { %812 = vmatpush.bf16.msrb.mxu3 %v1306_v38 }
  0x67   :  { %887 = vmatpush.bf16.msra.mxu0 %v1321_v39 }
  0x6b   :  { %888 = vmatpush.bf16.msra.mxu0 %v1320_v40  ;;  %v1346_v40 = vld [vmem:[%s1805_s11 + $0x5] ss:$0 sm:$0xff] }
  0x6f   :  { %889 = vmatpush.bf16.msra.mxu0 %v1319_v41 }
  0x73   :  { %890 = vmatpush.bf16.msra.mxu0 %v1318_v42 }
  0x77   :  { %891 = vmatpush.bf16.msra.mxu0 %v1317_v57 }
  0x7b   :  { %892 = vmatpush.bf16.msra.mxu0 %v1316_v58 }
  0x7f   :  { %893 = vmatpush.bf16.msra.mxu0 %v1315_v59 }
  0x83   :  { %894 = vmatpush.bf16.msra.mxu0 %v1314_v60 }
  0x9c   :  { %v452_v1 = vpop.permute.xlu1 %451  ;;  %v487_v4 = vpop.permute.xlu0 %486 }
  0xa4   :  { %v457_v18 = vpop.permute.xlu1 %456  ;;  %v491_v21 = vpop.permute.xlu0 %490 }
  0xc3   :  { %v339_v62 = vpop.f32.mrf.mxu0 }
  0xc4   :  { %v340_v0 = vadd.f32 %v1341_v61, %v339_v62  ;;  %v1344_v62 = vld [vmem:[%s1805_s11 + $0x3] ss:$0 sm:$0xff] }
  0xc5   :  { %v353_v63 = vpop.f32.mrf.mxu1 }
  0xc6   :  { %v354_v5 = vadd.f32 %v353_v63, %v340_v0 }
  0xc8   :  { %1348 = vtanh.f32 %v354_v5  ;;  %v1345_v5 = vld [vmem:[%s1805_s11 + $0x4] ss:$0 sm:$0xff] }
  0xca   :  { %v444_v3 = vpop.f32.mrf.mxu2 }
  0xcb   :  { %v480_v6 = vpop.f32.mrf.mxu3  ;;  %v341_v7 = vpop.f32.mrf.mxu0  ;;  %v445_v8 = vadd.f32 %v1342_v2, %v444_v3 }
  0xcc   :  { %v342_v9 = vadd.f32 %v1341_v61, %v341_v7  ;;  %v481_v11 = vadd.f32 %v1342_v2, %v480_v6 }
  0xcd   :  { %v355_v10 = vpop.f32.mrf.mxu1  ;;  %v459_v13 = vmul.f32 %v452_v1, %v445_v8 }
  0xce   :  { %v356_v12 = vadd.f32 %v355_v10, %v342_v9  ;;  %v493_v14 = vmul.f32 %v487_v4, %v481_v11  ;;  %v1349_v20 = vpop.eup %1348 }
  0xd0   :  { %1350 = vtanh.f32 %v356_v12  ;;  %v903_v12 = vlaneseq }
  0xd1   :  { %1352 = vtanh.f32 %v459_v13 }
  0xd2   :  { %v446_v15 = vpop.f32.mrf.mxu2  ;;  %1354 = vtanh.f32 %v493_v14  ;;  %v904_v13 = vand.u32 127, %v903_v12 }
  0xd3   :  { %v447_v16 = vadd.f32 %v1342_v2, %v446_v15  ;;  %v482_v17 = vpop.f32.mrf.mxu3 }
  0xd4   :  { %v483_v19 = vadd.f32 %v1342_v2, %v482_v17  ;;  %vm905_vm0 = vcmp.lt.s32.totalorder %v904_v13, 32 }
  0xd5   :  { %v460_v22 = vmul.f32 %v457_v18, %v447_v16  ;;  %v1629_v16 = vmov 0.0  }
  0xd6   :  { %v494_v23 = vmul.f32 %v491_v21, %v483_v19  ;;  %v1351_v24 = vpop.eup %1350  ;;  %v1253_v17 = vsel %vm905_vm0, 1.0, %v1629_v16 }
  0xd7   :  { %1356 = vtanh.f32 %v460_v22  ;;  %v514_v25 = vpack.c.bf16 %v1351_v24, %v1349_v20  ;;  %v1353_v26 = vpop.eup %1352 }
  0xd8   :  { %1358 = vtanh.f32 %v494_v23  ;;  %v1355_v27 = vpop.eup %1354 }
  0xd9   :  { %587 = vmatmul.bf16.vlgmr.msrb.gmra.mxu0 %v514_v25 }
  0xdd   :  { %v1357_v28 = vpop.eup %1356 }
  0xde   :  { %v1359_v29 = vpop.eup %1358  ;;  %v497_v30 = vpack.c.bf16 %v1357_v28, %v1353_v26 }
  0xdf   :  { %v655_v31 = vpack.c.bf16 %v1359_v29, %v1355_v27 }
  0xe0   :  { %649 = vmatmul.bf16.vlgmr.msrb.gmra.mxu1 %v497_v30 }
  0xe1   :  { %728 = vmatmul.bf16.vlgmr.msrb.gmra.mxu2 %v655_v31 }
 0x156   :  { %v588_v44 = vpop.f32.mrf.mxu0 }
 0x15d   :  { %v650_v43 = vpop.f32.mrf.mxu1 }
 0x15e   :  { %v651_v47 = vadd.f32 %v650_v43, %v588_v44  ;;  %v590_v48 = vpop.f32.mrf.mxu0  ;;  %v1347_v43 = vld [vmem:[%s1805_s11 + $0x6] ss:$0 sm:$0xff]  ;;  %s1631_s11 = smov 128  }
 0x164   :  { %v729_v45 = vpop.f32.mrf.mxu2 }
 0x165   :  { %v652_v46 = vpop.f32.mrf.mxu1  ;;  %v734_v49 = vadd.f32 %v729_v45, %v651_v47 }
 0x166   :  { %v653_v51 = vadd.f32 %v652_v46, %v590_v48 }
 0x167   :  { %v737_v54 = vadd.f32 %v1343_v50, %v734_v49 }
 0x16c   :  { %v731_v52 = vpop.f32.mrf.mxu2 }
 0x16d   :  { %v735_v53 = vadd.f32 %v731_v52, %v653_v51 }
 0x16f   :  { %v738_v55 = vadd.f32 %v1343_v50, %v735_v53 }
 0x171   :  { %v739_v56 = vpack.c.bf16 %v738_v55, %v737_v54 }
 0x173   :  { %813 = vmatmul.bf16.vlgmr.msrb.gmra.mxu3 %v739_v56 }
 0x1f6   :  { %v814_v61 = vpop.f32.mrf.mxu3 }
 0x1f7   :  { %v815_v63 = vadd.f32 %v1344_v62, %v814_v61 }
 0x1f9   :  { %v819_v2 = vmax.f32 %v815_v63, 0.0 }
 0x1fe   :  { %v816_v0 = vpop.f32.mrf.mxu3 }
 0x1ff   :  { %v817_v1 = vadd.f32 %v1344_v62, %v816_v0 }
 0x201   :  { %v820_v3 = vmax.f32 %v817_v1, 0.0 }
 0x203   :  { %v821_v4 = vpack.c.bf16 %v820_v3, %v819_v2 }
 0x205   :  { %895 = vmatmul.bf16.vlgmr.msra.gmra.mxu0 %v821_v4 }
 0x282   :  { %v896_v6 = vpop.f32.mrf.mxu0 }
 0x283   :  { %v897_v7 = vadd.f32 %v1345_v5, %v896_v6 }
 0x285   :  { %v901_v8 = vadd.f32 %v897_v7, %v737_v54 }
 0x287   :  { %908 = vadd.xlane.f32.xlu2 %v901_v8 }
 0x28a   :  { %v898_v9 = vpop.f32.mrf.mxu0 }
 0x28b   :  { %v899_v10 = vadd.f32 %v1345_v5, %v898_v9 }
 0x28d   :  { %v902_v11 = vadd.f32 %v899_v10, %v738_v55 }
 0x28f   :  { %910 = vadd.xlane.f32.xlu2 %v902_v11 }
 0x2fa   :  { %v909_v14 = vpop.xlane.xlu2 %908 }
 0x2fb   :  { %v912_v15 = vmul.f32 0.03125, %v909_v14 }
 0x2fd   :  { %v914_v18 = vsub.f32 %v901_v8, %v912_v15 }
 0x2ff   :  { %v916_v19 = vmul.f32 %v1253_v17, %v914_v18 }
 0x301   :  { %v918_v20 = vmul.f32 %v916_v19, %v916_v19 }
 0x302   :  { %v911_v21 = vpop.xlane.xlu2 %910 }
 0x303   :  { %v913_v22 = vmul.f32 0.03125, %v911_v21  ;;  %920 = vadd.xlane.f32.xlu0 %v918_v20 }
 0x305   :  { %v915_v23 = vsub.f32 %v902_v11, %v913_v22 }
 0x307   :  { %v917_v24 = vmul.f32 %v1253_v17, %v915_v23 }
 0x309   :  { %v919_v25 = vmul.f32 %v917_v24, %v917_v24 }
 0x30b   :  { %922 = vadd.xlane.f32.xlu1 %v919_v25 }
 0x376   :  { %v921_v26 = vpop.xlane.xlu0 %920 }
 0x377   :  { %v924_v27 = vmul.f32 0.03125, %v921_v26 }
 0x379   :  { %v926_v28 = vadd.f32 1e-05, %v924_v27 }
 0x37b   :  { %1360 = vrsqrt.f32 %v926_v28  ;;  %vm934_vm2 = vweird.f32 %v926_v28 }
 0x37e   :  { %v923_v29 = vpop.xlane.xlu1 %922 }
 0x37f   :  { %v925_v30 = vmul.f32 0.03125, %v923_v29 }
 0x381   :  { %v1361_v31 = vpop.eup %1360  ;;  %v927_v32 = vadd.f32 1e-05, %v925_v30 }
 0x382   :  { %v929_v33 = vmul.f32 %v1361_v31, %v926_v28  ;;  %vm935_vm1 = vweird.f32 %v1361_v31 }
 0x383   :  { %1362 = vrsqrt.f32 %v927_v32  ;;  %vm936_vm3 = vmor %vm934_vm2, %vm935_vm1  ;;  %vm944_vm5 = vweird.f32 %v927_v32 }
 0x384   :  { %v930_v34 = vmul.f32 %v1361_v31, %v929_v33 }
 0x386   :  { %v931_v35 = vmul.f32 0.5, %v930_v34 }
 0x388   :  { %v932_v36 = vsub.f32 1.5, %v931_v35 }
 0x389   :  { %v1363_v37 = vpop.eup %1362 }
 0x38a   :  { %v933_v38 = vmul.f32 %v1361_v31, %v932_v36  ;;  %v939_v39 = vmul.f32 %v1363_v37, %v927_v32  ;;  %vm945_vm4 = vweird.f32 %v1363_v37 }
 0x38b   :  { %vm946_vm6 = vmor %vm944_vm5, %vm945_vm4 }
 0x38c   :  { %v937_v41 = vsel %vm936_vm3, %v1361_v31, %v933_v38  ;;  %v940_v42 = vmul.f32 %v1363_v37, %v939_v39 }
 0x38d   :  { %v948_v44 = vmul.f32 %v937_v41, %v916_v19 }
 0x38e   :  { %v941_v45 = vmul.f32 0.5, %v940_v42 }
 0x38f   :  { %v951_v46 = vmul.f32 %v1346_v40, %v948_v44 }
 0x390   :  { %v942_v47 = vsub.f32 1.5, %v941_v45 }
 0x391   :  { %v954_v48 = vadd.f32 %v1347_v43, %v951_v46 }
 0x392   :  { %v943_v49 = vmul.f32 %v1363_v37, %v942_v47 }
 0x393   :  { %956 = vst [vmem:[#allocation17] sm:$0xff] %v954_v48 }
 0x394   :  { %v947_v50 = vsel %vm946_vm6, %v1363_v37, %v943_v49 }
 0x395   :  { %v949_v51 = vmul.f32 %v947_v50, %v917_v24 }
 0x397   :  { %v952_v52 = vmul.f32 %v1346_v40, %v949_v51 }
 0x399   :  { %v955_v53 = vadd.f32 %v1347_v43, %v952_v52 }
 0x39b   :  { %957 = vst [vmem:[#allocation17 + $0x8] sm:$0xff] %v955_v53 }
 0x39c   :  { %970 = dma.vmem_to_hbm [thread:$0]  %s963_s8, 256, %s965_s29, [#allocation4], %s1631_s11, %s1631_s11, %s1632_s30  }
 0x39d   :  { %1614 = dma.done.wait [#allocation4], 256  }
 0x39e   :  { %1615 = vsyncadd [#allocation4], 4294967040 }
 0x39f   :  { %975 = vsyncpa [#allocation3], 1 }
 0x3a0   :  { %976 = vsyncpa [#allocation6], 1 }
 0x3a1   :  { %977 = vsyncpa [#allocation9], 1 }
 0x3a2   :  { %978 = vsyncpa [#allocation12], 1 }
 0x3a3   :  { %979 = vsyncpa [#allocation15], 1 }
 0x3a4   :  { %980 = vsyncpa [#allocation4], 1 }

</bundles_post_ra>
